<compile_context>
chip_gen: v7x
topology: tpu7x:2x2x1
jax: 0.10.0
libtpu: 0.0.40
codegen_flags: <defaults>
</compile_context>

<pallas_src>
import numpy as np

import jax
import jax.numpy as jnp
from jax.experimental import pallas as pl
from jax.experimental.pallas import tpu as pltpu


def _build_indices(length_q: int, length_k: int, max_rel: int) -> np.ndarray:
    """Static (trace-time) relative-position indices, matching PyTorch exactly.

    NOTE: the PyTorch forward decrements length_q BEFORE taking
    int(length_q ** 0.5), so the spatial side is sq = int(sqrt(length_q - 1)),
    and the same sq is applied to both q and k coordinates (shared square
    grid), exactly as in the reference module.
    Returns a (2, Lq*Lk) int32 array: row 0 = vertical-table indices,
    row 1 = horizontal-table indices (both already cls-padded).
    """
    lq, lk = length_q - 1, length_k - 1
    sq = int(lq ** 0.5)
    assert sq * sq == lq, "length_q - 1 must be a perfect square (H*W grid + cls)"
    rq = np.arange(lq)
    rk = np.arange(lk)
    dv = rk[None, :] // sq - rq[:, None] // sq
    dh = rk[None, :] % sq - rq[:, None] % sq
    fv = np.clip(dv, -max_rel, max_rel) + max_rel + 1
    fh = np.clip(dh, -max_rel, max_rel) + max_rel + 1
    # Row/col 0 are the padded (cls-token) slots -> index 0.
    fv = np.pad(fv, ((1, 0), (1, 0)), constant_values=0)
    fh = np.pad(fh, ((1, 0), (1, 0)), constant_values=0)
    return np.stack([fv.ravel(), fh.ravel()], axis=0).astype(np.int32)


def relative_position_2d(table_v: jax.Array,
                         table_h: jax.Array,
                         length_q: int,
                         length_k: int,
                         max_relative_position: int = 14) -> jax.Array:
    """Pallas implementation of RelativePosition2D.forward(length_q, length_k)."""
    T, D = table_v.shape
    assert T == 2 * max_relative_position + 2
    assert table_h.shape == (T, D)

    Lq, Lk = int(length_q), int(length_k)
    rows = Lq * Lk
    twoT = 2 * T

    # Tiny compile-time constant: two gather indices per (q, k) pair.
    idx = jnp.asarray(_build_indices(Lq, Lk, max_relative_position))      # (2, rows) i32

    # Fused + transposed table: (D, 2T), f32 keeps the one-hot gather exact.
    table_cat_t = jnp.concatenate([table_v, table_h], axis=0).astype(jnp.float32).T

    def _rpe_kernel(idx_ref, table_t_ref, out_t_ref):
        # Rebuild the transposed two-hot selector on the VPU: (2T, rows).
        fv = idx_ref[0:1, :]                                              # (1, rows)
        fh = idx_ref[1:2, :]                                              # (1, rows)
        t_ids = jax.lax.broadcasted_iota(jnp.int32, (twoT, rows), 0)
        two_hot_t = jnp.logical_or(t_ids == fv, t_ids == fh + T).astype(jnp.float32)
        # Single MXU pass, lane-dense result: (D, 2T) @ (2T, rows) -> (D, rows).
        out_t_ref[...] = jnp.dot(table_t_ref[...], two_hot_t,
                                 preferred_element_type=jnp.float32)

    out_t = pl.pallas_call(
        _rpe_kernel,
        out_shape=jax.ShapeDtypeStruct((D, rows), jnp.float32),
        in_specs=[
            pl.BlockSpec(memory_space=pltpu.MemorySpace.VMEM),   # idx (2, rows)
            pl.BlockSpec(memory_space=pltpu.MemorySpace.VMEM),   # table^T (D, 2T)
        ],
        out_specs=pl.BlockSpec(memory_space=pltpu.MemorySpace.VMEM),
    )(idx, table_cat_t)

    # Transpose back + free reshape in the wrapper (tiny; fuses with consumers).
    return out_t.T.reshape(Lq, Lk, D).astype(table_v.dtype)


def relative_position_2d_ref(table_v, table_h, length_q, length_k,
                             max_relative_position=14):
    """Pure-JAX reference matching the PyTorch module exactly."""
    lq, lk = length_q - 1, length_k - 1
    sq = int(lq ** 0.5)  # PyTorch: int(length_q ** 0.5) AFTER the -1 decrement
    rq = jnp.arange(lq)
    rk = jnp.arange(lk)
    dv = rk[None, :] // sq - rq[:, None] // sq
    dh = rk[None, :] % sq - rq[:, None] % sq
    m = max_relative_position
    fv = jnp.clip(dv, -m, m) + m + 1
    fh = jnp.clip(dh, -m, m) + m + 1
    fv = jnp.pad(fv, ((1, 0), (1, 0)), constant_values=0)
    fh = jnp.pad(fh, ((1, 0), (1, 0)), constant_values=0)
    return table_v[fv] + table_h[fh]


if __name__ == "__main__":
    head_dims = 32
    max_relative_position = 14
    length_q = length_k = 17          # 4x4 spatial grid + 1 cls token

    T = max_relative_position * 2 + 2

    key = jax.random.PRNGKey(0)
    kv, kh = jax.random.split(key)
    # trunc_normal_(std=0.02): truncated normal in [-2, 2] sigma, scaled by 0.02
    table_v = (jax.random.truncated_normal(kv, -2.0, 2.0, (T, head_dims),
                                           dtype=jnp.float32) * 0.02)
    table_h = (jax.random.truncated_normal(kh, -2.0, 2.0, (T, head_dims),
                                           dtype=jnp.float32) * 0.02)

    out = relative_position_2d(table_v, table_h, length_q, length_k,
                               max_relative_position)
    out = jax.block_until_ready(out)

    ref = relative_position_2d_ref(table_v, table_h, length_q, length_k,
                                   max_relative_position)
    assert out.shape == (length_q, length_k, head_dims)
    assert jnp.allclose(out, ref, atol=1e-6), "Pallas kernel mismatch vs reference"

    print("KERNEL_OK")
</pallas_src>

<mosaic_0001>
module attributes {stable_mosaic.version = 11 : i64} {
  func.func @_rpe_kernel(%arg0: memref<2x289xi32, #tpu.memory_space<vmem>>, %arg1: memref<32x60xf32, #tpu.memory_space<vmem>>, %arg2: memref<32x289xf32, #tpu.memory_space<vmem>>) attributes {dimension_semantics = [], scalar_prefetch = 0 : i64, scratch_operands = 0 : i64, tpu.core_type = #tpu.core_type<tc>} {
    %c0 = arith.constant 0 : index
    %c0_0 = arith.constant 0 : index
    %0 = vector.load %arg0[%c0, %c0_0] : memref<2x289xi32, #tpu.memory_space<vmem>>, vector<1x289xi32>
    %c1 = arith.constant 1 : index
    %c0_1 = arith.constant 0 : index
    %1 = vector.load %arg0[%c1, %c0_1] : memref<2x289xi32, #tpu.memory_space<vmem>>, vector<1x289xi32>
    %2 = tpu.iota {dimensions = array<i32: 0>} : vector<60x289xi32>
    %3 = vector.broadcast %0 : vector<1x289xi32> to vector<60x289xi32>
    %4 = arith.cmpi eq, %2, %3 : vector<60x289xi32>
    %c30_i32 = arith.constant 30 : i32
    %5 = vector.broadcast %c30_i32 : i32 to vector<1x289xi32>
    %6 = arith.addi %1, %5 : vector<1x289xi32>
    %7 = vector.broadcast %6 : vector<1x289xi32> to vector<60x289xi32>
    %8 = arith.cmpi eq, %2, %7 : vector<60x289xi32>
    %9 = arith.ori %4, %8 : vector<60x289xi1>
    %10 = arith.extui %9 : vector<60x289xi1> to vector<60x289xi32>
    %11 = arith.sitofp %10 : vector<60x289xi32> to vector<60x289xf32>
    %c0_2 = arith.constant 0 : index
    %c0_3 = arith.constant 0 : index
    %12 = vector.load %arg1[%c0_2, %c0_3] : memref<32x60xf32, #tpu.memory_space<vmem>>, vector<32x60xf32>
    %cst = arith.constant dense<0.000000e+00> : vector<32x289xf32>
    %13 = tpu.matmul %12, %11, %cst {dimension_numbers = #tpu.dot_dimension_numbers<[1], [0], [0], [1], [0, 0, 1, 1], [], []>} : vector<32x60xf32>, vector<60x289xf32>, vector<32x289xf32> -> vector<32x289xf32>
    %c0_4 = arith.constant 0 : index
    %c0_5 = arith.constant 0 : index
    %14 = vector.load %arg2[%c0_4, %c0_5] : memref<32x289xf32, #tpu.memory_space<vmem>>, vector<32x289xf32>
    tpu.vector_store %arg2[%c0_4, %c0_5], %13 {strides = array<i32>} : memref<32x289xf32, #tpu.memory_space<vmem>>, vector<32x289xf32>,
    return
  }
}

</mosaic_0001>

<bundles_post_ra>
// kernel: tpu_custom_call.1
= control target key start
LH: loop header
LB: loop body
LE: loop exit
PB: predicated region body
PF: predicated region fallthrough
CT: control target
= control target key end

     0   :  { %7 = vsyncpa [#allocation3], 0  ;;  %s851_s0 = inlined_call_operand.hbm [shape: s32[2,289], index: 0, kind: input, shape index: {}]   ;;  %s852_s1 = inlined_call_operand.hbm [shape: f32[32,60], index: 1, kind: input, shape index: {}]   ;;  %s853_s2 = inlined_call_operand.hbm [shape: f32[32,289], index: 2, kind: output, shape index: {}]  }
   0x1   :  { %8 = vsyncpa [#allocation6], 0 }
   0x2   :  { %9 = vsyncpa [#allocation4], 0  ;;  %s635_s9 = smov [#allocation2]   ;;  %s636_s11 = smov [#allocation5]  }
   0x3   :  { %s16_s10 = sshll.u32 %s635_s9, 4  ;;  %s25_s12 = sshll.u32 %s636_s11, 4  ;;  %s17_s10 = int_to_ptr.vmem [resolvable:$true] %s16_s10  ;;  %s660_s12 = int_to_ptr.vmem [resolvable:$true] %s25_s12 }
   0x4   :  { %s563_s15 = scalar_lea.hbm %s851_s0, 96 }
   0x5   :  { %p564_p0 = scmp.ne.s32.totalorder %s851_s0, %s563_s15  ;;  %p567_p1 = scmp.lt.u32.totalorder %s563_s15, %s851_s0 }
   0x7   :  { %p569_p2 = pnand %p567_p1, %p564_p0 }
   0x9   :  { %572 = shalt.err (!%p569_p2)
}
   0xa   :  { %s573_s20 = scalar_lea.vmem %s17_s10, 96  ;;  %p578_p4 = scmp.lt.s32.totalorder %s17_s10, %s17_s10 }
   0xb   :  { %p574_p3 = scmp.ne.s32.totalorder %s17_s10, %s573_s20  ;;  %p579_p5 = scmp.lt.s32.totalorder %s573_s20, %s573_s20 }
   0xd   :  { %p580_p6 = por %p579_p5, %p578_p4 }
   0xf   :  { %p581_p7 = pnand %p580_p6, %p574_p3 }
  0x11   :  { %584 = shalt.err (!%p581_p7)
}
  0x12   :  { %19 = dma.hbm_to_vmem [thread:$0]  %s851_s0, 96, %s17_s10, [#allocation3]  }
  0x13   :  { %s585_s25 = scalar_lea.hbm %s852_s1, 512 }
  0x14   :  { %p586_p8 = scmp.ne.s32.totalorder %s852_s1, %s585_s25  ;;  %p589_p9 = scmp.lt.u32.totalorder %s585_s25, %s852_s1 }
  0x16   :  { %p591_p10 = pnand %p589_p9, %p586_p8 }
  0x18   :  { %594 = shalt.err (!%p591_p10)
}
  0x19   :  { %s595_s30 = scalar_lea.vmem %s660_s12, 512  ;;  %p600_p12 = scmp.lt.s32.totalorder %s660_s12, %s660_s12 }
  0x1a   :  { %p596_p11 = scmp.ne.s32.totalorder %s660_s12, %s595_s30  ;;  %p601_p13 = scmp.lt.s32.totalorder %s595_s30, %s595_s30 }
  0x1c   :  { %p602_p0 = por %p601_p13, %p600_p12 }
  0x1e   :  { %p603_p1 = pnand %p602_p0, %p596_p11 }
  0x20   :  { %606 = shalt.err (!%p603_p1)
}
  0x21   :  { %s637_s0 = smov 128   ;;  %s638_s3 = smov 8  }
  0x22   :  { %31 = dma.hbm_to_vmem [thread:$0]  %s852_s1, 512, %s660_s12, [#allocation6], %s637_s0, %s637_s0, %s638_s3  }
  0x23   :  { %629 = dma.done.wait [#allocation3], 96  }
  0x24   :  { %630 = vsyncadd [#allocation3], 4294967200 }
  0x25   :  { %631 = dma.done.wait [#allocation6], 512  }
  0x26   :  { %632 = vsyncadd [#allocation6], 4294966784  ;;  %v41_v0 = vlaneseq  ;;  %v639_v1 = vmov 0.0   ;;  %v38_v6 = vld [vmem:[#allocation2] ss:$2 sm:$0x7] }
  0x27   :  { %286 = vmatprep.mubr.f32.mxu0 %v639_v1  ;;  %v40_v7 = vld [vmem:[#allocation2 + $0x1] ss:$2 sm:$0x7]  ;;  %v699_v10 = vld [vmem:[#allocation5] sm:$0xff]  ;;  %vm854_vm0 = vcmask 490496   ;;  %v641_v25 = vmov 1.0  }
  0x28   :  { %v692_v2 = vshrl.u32 %v41_v0, 7  ;;  %v86_v9 = vadd.s32 30, %v40_v7  ;;  %511 = vmatprep.mubr.msk.f32.mxu1 %vm854_vm0, %v699_v10  ;;  %v640_v17 = vmov 1.0|1.0   ;;  %v196_v31 = vld [vmem:[#allocation5 + $0x8] sm:$0xff]  ;;  %v197_v32 = vld [vmem:[#allocation5 + $0x10] sm:$0xff] }
  0x29   :  { %v198_v33 = vld [vmem:[#allocation5 + $0x18] sm:$0xff]  ;;  %s642_s1 = smov [#allocation7]  }
  0x2a   :  { %v56_v3 = vsub.s32 1, %v692_v2  ;;  %v52_v4 = vsub.s32 0, %v692_v2  ;;  %v43_v5 = vadd.s32 8, %v692_v2  ;;  %v716_v14 = vadd.s32 16, %v692_v2  ;;  %s414_s6 = sshll.u32 %s642_s1, 4  ;;  %s415_s6 = int_to_ptr.vmem [resolvable:$true] %s414_s6 }
  0x2b   :  { %v723_v15 = vadd.s32 24, %v692_v2  ;;  %v60_v16 = vsub.s32 2, %v692_v2  ;;  %v751_v20 = vadd.s32 32, %v692_v2  ;;  %v759_v21 = vadd.s32 40, %v692_v2  ;;  %s607_s7 = scalar_lea.vmem %s415_s6, 1536  ;;  %p612_p3 = scmp.lt.s32.totalorder %s415_s6, %s415_s6 }
  0x2c   :  { %v697_v8 = vrot.slane %v38_v6, %v56_v3  ;;  %v701_v11 = vrot.slane %v38_v6, %v52_v4  ;;  %v707_v12 = vrot.slane %v86_v9, %v56_v3  ;;  %v710_v13 = vrot.slane %v86_v9, %v52_v4  ;;  %p608_p2 = scmp.ne.s32.totalorder %s415_s6, %s607_s7  ;;  %p613_p4 = scmp.lt.s32.totalorder %s607_s7, %s607_s7 }
  0x2d   :  { %v737_v18 = vrot.slane %v38_v6, %v60_v16  ;;  %v739_v19 = vrot.slane %v86_v9, %v60_v16  ;;  %v48_v22 = vadd.s32 48, %v692_v2  ;;  %v49_v23 = vadd.s32 56, %v692_v2 }
  0x2e   :  { %vm63_vm1 = vcmp.eq.s32.totalorder %v692_v2, %v697_v8  ;;  %vm66_vm2 = vcmp.eq.s32.totalorder %v43_v5, %v697_v8  ;;  %vm100_vm3 = vcmp.eq.s32.totalorder %v692_v2, %v707_v12  ;;  %vm103_vm4 = vcmp.eq.s32.totalorder %v43_v5, %v707_v12  ;;  %p614_p5 = por %p613_p4, %p612_p3 }
  0x2f   :  { %vm124_vm5 = vmor %vm63_vm1, %vm100_vm3  ;;  %vm62_vm6 = vcmp.eq.s32.totalorder %v692_v2, %v701_v11  ;;  %vm99_vm7 = vcmp.eq.s32.totalorder %v692_v2, %v710_v13  ;;  %vm65_vm9 = vcmp.eq.s32.totalorder %v43_v5, %v701_v11  ;;  %vm102_vm10 = vcmp.eq.s32.totalorder %v43_v5, %v710_v13 }
  0x30   :  { %vm127_vm8 = vmor %vm66_vm2, %vm103_vm4  ;;  %vm69_vm13 = vcmp.eq.s32.totalorder %v716_v14, %v697_v8  ;;  %vm106_vm14 = vcmp.eq.s32.totalorder %v716_v14, %v707_v12  ;;  %vm72_vm1 = vcmp.eq.s32.totalorder %v723_v15, %v697_v8  ;;  %vm109_vm2 = vcmp.eq.s32.totalorder %v723_v15, %v707_v12  ;;  %p615_p6 = pnand %p614_p5, %p608_p2 }
  0x31   :  { %vm517_vm11 = vmpackc.low %vm127_vm8, %vm124_vm5  ;;  %vm68_vm5 = vcmp.eq.s32.totalorder %v716_v14, %v701_v11  ;;  %vm71_vm8 = vcmp.eq.s32.totalorder %v723_v15, %v701_v11 }
  0x32   :  { %518 = vmatprep.subr.msk.bf16.mxu0 %vm517_vm11, %v640_v17  ;;  %vm123_vm12 = vmor %vm62_vm6, %vm99_vm7  ;;  %vm105_vm6 = vcmp.eq.s32.totalorder %v716_v14, %v710_v13 }
  0x33   :  { %vm126_vm15 = vmor %vm65_vm9, %vm102_vm10  ;;  %vm108_vm9 = vcmp.eq.s32.totalorder %v723_v15, %v710_v13 }
  0x34   :  { %vm519_vm3 = vmpackc.low %vm126_vm15, %vm123_vm12  ;;  %vm64_vm12 = vcmp.eq.s32.totalorder %v692_v2, %v737_v18  ;;  %vm67_vm15 = vcmp.eq.s32.totalorder %v43_v5, %v737_v18 }
  0x35   :  { %520 = vmatpush1.bf16.msk.msra.mxu0 %vm519_vm3, %v640_v17  ;;  %vm130_vm4 = vmor %vm69_vm13, %vm106_vm14  ;;  %vm101_vm13 = vcmp.eq.s32.totalorder %v692_v2, %v739_v19 }
  0x36   :  { %vm133_vm7 = vmor %vm72_vm1, %vm109_vm2  ;;  %vm104_vm1 = vcmp.eq.s32.totalorder %v43_v5, %v739_v19 }
  0x37   :  { %vm521_vm10 = vmpackc.low %vm133_vm7, %vm130_vm4  ;;  %vm75_vm4 = vcmp.eq.s32.totalorder %v751_v20, %v697_v8  ;;  %vm78_vm7 = vcmp.eq.s32.totalorder %v759_v21, %v697_v8 }
  0x38   :  { %522 = vmatprep.subr.msk.bf16.mxu0 %vm521_vm10, %v640_v17  ;;  %vm129_vm11 = vmor %vm68_vm5, %vm105_vm6  ;;  %vm112_vm5 = vcmp.eq.s32.totalorder %v751_v20, %v707_v12 }
  0x39   :  { %vm132_vm14 = vmor %vm71_vm8, %vm108_vm9  ;;  %vm115_vm8 = vcmp.eq.s32.totalorder %v759_v21, %v707_v12 }
  0x3a   :  { %vm523_vm2 = vmpackc.low %vm132_vm14, %vm129_vm11  ;;  %vm74_vm11 = vcmp.eq.s32.totalorder %v751_v20, %v701_v11  ;;  %vm77_vm14 = vcmp.eq.s32.totalorder %v759_v21, %v701_v11 }
  0x3b   :  { %524 = vmatpush1.bf16.msk.msra.mxu0 %vm523_vm2, %v640_v17  ;;  %vm125_vm3 = vmor %vm64_vm12, %vm101_vm13  ;;  %vm111_vm12 = vcmp.eq.s32.totalorder %v751_v20, %v710_v13 }
  0x3c   :  { %vm128_vm6 = vmor %vm67_vm15, %vm104_vm1  ;;  %vm114_vm15 = vcmp.eq.s32.totalorder %v759_v21, %v710_v13 }
  0x3d   :  { %vm535_vm9 = vmpackc.low %vm128_vm6, %vm125_vm3  ;;  %vm70_vm3 = vcmp.eq.s32.totalorder %v716_v14, %v737_v18  ;;  %vm73_vm6 = vcmp.eq.s32.totalorder %v723_v15, %v737_v18 }
  0x3e   :  { %536 = vmatprep.subr.msk.bf16.mxu1 %vm535_vm9, %v640_v17  ;;  %vm136_vm10 = vmor %vm75_vm4, %vm112_vm5  ;;  %vm107_vm4 = vcmp.eq.s32.totalorder %v716_v14, %v739_v19 }
  0x3f   :  { %vm139_vm13 = vmor %vm78_vm7, %vm115_vm8  ;;  %538 = vmatpush3.bf16.msk.msra.mxu1 %vm535_vm9, %v640_v17  ;;  %vm110_vm7 = vcmp.eq.s32.totalorder %v723_v15, %v739_v19 }
  0x40   :  { %vm525_vm1 = vmpackc.low %vm139_vm13, %vm136_vm10  ;;  %vm81_vm10 = vcmp.eq.s32.totalorder %v48_v22, %v697_v8  ;;  %vm84_vm13 = vcmp.eq.s32.totalorder %v49_v23, %v697_v8 }
  0x41   :  { %526 = vmatprep.subr.msk.bf16.mxu0 %vm525_vm1, %v640_v17  ;;  %vm135_vm2 = vmor %vm74_vm11, %vm111_vm12  ;;  %vm118_vm11 = vcmp.eq.s32.totalorder %v48_v22, %v707_v12  ;;  %vm121_vm1 = vcmp.eq.s32.totalorder %v49_v23, %v707_v12 }
  0x42   :  { %vm138_vm5 = vmor %vm77_vm14, %vm114_vm15  ;;  %vm212_vm15 = vcmask 1043456  }
  0x43   :  { %vm527_vm8 = vmpackc.low %vm138_vm5, %vm135_vm2  ;;  %vm80_vm2 = vcmp.eq.s32.totalorder %v48_v22, %v701_v11  ;;  %vm117_vm5 = vcmp.eq.s32.totalorder %v48_v22, %v710_v13 }
  0x44   :  { %528 = vmatpush1.bf16.msk.msra.mxu0 %vm527_vm8, %v640_v17  ;;  %vm131_vm9 = vmor %vm70_vm3, %vm107_vm4  ;;  %vm83_vm3 = vcmp.eq.s32.totalorder %v49_v23, %v701_v11  ;;  %vm120_vm4 = vcmp.eq.s32.totalorder %v49_v23, %v710_v13 }
  0x45   :  { %vm134_vm12 = vmor %vm73_vm6, %vm110_vm7 }
  0x46   :  { %vm539_vm14 = vmpackc.low %vm134_vm12, %vm131_vm9  ;;  %vm76_vm9 = vcmp.eq.s32.totalorder %v751_v20, %v737_v18  ;;  %vm79_vm12 = vcmp.eq.s32.totalorder %v759_v21, %v737_v18 }
  0x47   :  { %540 = vmatprep.subr.msk.bf16.mxu1 %vm539_vm14, %v640_v17  ;;  %vm142_vm0 = vmor %vm81_vm10, %vm118_vm11  ;;  %vm113_vm10 = vcmp.eq.s32.totalorder %v751_v20, %v739_v19 }
  0x48   :  { %vm145_vm8 = vmor %vm84_vm13, %vm121_vm1  ;;  %542 = vmatpush3.bf16.msk.msra.mxu1 %vm539_vm14, %v640_v17  ;;  %vm116_vm13 = vcmp.eq.s32.totalorder %v759_v21, %v739_v19  ;;  %vm82_vm14 = vcmp.eq.s32.totalorder %v48_v22, %v737_v18 }
  0x49   :  { %v449_v24 = vsel %vm145_vm8, 1.0, %v639_v1  ;;  %vm530_vm6 = vmpackc.low %vm212_vm15, %vm142_vm0  ;;  %vm85_vm8 = vcmp.eq.s32.totalorder %v49_v23, %v737_v18 }
  0x4a   :  { %v529_v26 = vpack.c.bf16 %v449_v24, %v641_v25  ;;  %vm141_vm7 = vmor %vm80_vm2, %vm117_vm5  ;;  %vm119_vm2 = vcmp.eq.s32.totalorder %v48_v22, %v739_v19 }
  0x4b   :  { %vm144_vm11 = vmor %vm83_vm3, %vm120_vm4  ;;  %vm122_vm3 = vcmp.eq.s32.totalorder %v49_v23, %v739_v19 }
  0x4c   :  { %531 = vmatprep.subr.msk.bf16.mxu0 %vm530_vm6, %v529_v26  ;;  %v448_v27 = vsel %vm144_vm11, 1.0, %v639_v1  ;;  %vm533_vm0 = vmpackc.low %vm212_vm15, %vm141_vm7  ;;  %vm855_vm7 = vcmask 490496  }
  0x4d   :  { %v532_v28 = vpack.c.bf16 %v448_v27, %v641_v25  ;;  %vm137_vm1 = vmor %vm76_vm9, %vm113_vm10 }
  0x4e   :  { %vm140_vm5 = vmor %vm79_vm12, %vm116_vm13 }
  0x4f   :  { %534 = vmatpush1.bf16.msk.msra.mxu0 %vm533_vm0, %v532_v28  ;;  %vm543_vm4 = vmpackc.low %vm140_vm5, %vm137_vm1 }
  0x50   :  { %544 = vmatprep.subr.msk.bf16.mxu1 %vm543_vm4, %v640_v17  ;;  %vm143_vm6 = vmor %vm82_vm14, %vm119_vm2  ;;  %vm398_vm14 = vcmask 269312  }
  0x51   :  { %546 = vmatpush3.bf16.msk.msra.mxu1 %vm543_vm4, %v640_v17  ;;  %vm146_vm11 = vmor %vm85_vm8, %vm122_vm3 }
  0x52   :  { %467 = vmatmul.mubr.msk.f32.vlgmr.msra.gmra.mrb[0].mxu0 %vm855_vm7, %v699_v10  ;;  %v450_v29 = vsel %vm146_vm11, 1.0, %v639_v1  ;;  %vm548_vm9 = vmpackc.low %vm212_vm15, %vm143_vm6 }
  0x53   :  { %292 = vmatprep.mubr.f32.mxu0 %v639_v1  ;;  %v547_v30 = vpack.c.bf16 %v450_v29, %v641_v25  ;;  %vm856_vm10 = vmmov %vm855_vm7 }
  0x54   :  { %vm857_vm12 = vmmov %vm855_vm7 }
  0x55   :  { %549 = vmatprep.subr.msk.bf16.mxu1 %vm548_vm9, %v547_v30  ;;  %vm858_vm13 = vmmov %vm855_vm7 }
  0x56   :  { %468 = vmatmul.mubr.msk.f32.gmra.mrb[2].mxu0 %vm856_vm10, %v196_v31  ;;  %552 = vmatpush3.bf16.msk.msra.mxu1 %vm548_vm9, %v547_v30  ;;  %vm859_vm0 = vmmov %vm855_vm7 }
  0x57   :  { %298 = vmatprep.mubr.f32.mxu0 %v639_v1  ;;  %vm860_vm15 = vmmov %vm859_vm0 }
  0x58   :  { %vm861_vm1 = vmmov %vm859_vm0 }
  0x59   :  { %512 = vmatmul.mubr.msk.f32.vlgmr.msra.gmra.mrb[0].mxu1 %vm857_vm12, %v196_v31 }
  0x5a   :  { %469 = vmatmul.mubr.msk.f32.gmra.mrb[4].mxu0 %vm858_vm13, %v197_v32  ;;  %514 = vmatprep.mubr.msk.f32.mxu1 %vm859_vm0, %v197_v32 }
  0x5b   :  { %304 = vmatprep.mubr.f32.mxu0 %v639_v1 }
  0x5d   :  { %515 = vmatmul.mubr.msk.f32.gmra.mrb[2].mxu1 %vm860_vm15, %v198_v33 }
  0x5e   :  { %470 = vmatmul.mubr.msk.f32.gmra.mrb[6].mxu0 %vm861_vm1, %v198_v33 }
 0x125   :  { %v288_v34 = vpop.f32.mrb[0].mxu0 }
 0x126   :  { %396 = vst [vmem:[#allocation7] sm:$0xff] %v288_v34  ;;  %v290_v35 = vpop.f32.mrb[1].mxu0 }
 0x127   :  { %397 = vst [vmem:[#allocation7 + $0x8] sm:$0xff] %v290_v35 }
 0x129   :  { %v294_v36 = vpop.f32.mrb[2].mxu0 }
 0x12a   :  { %400 = vst [vmem:[#allocation7 + $0x18] sm:$0xff] %v294_v36  ;;  %v296_v37 = vpop.f32.mrb[3].mxu0 }
 0x12b   :  { %401 = vst [vmem:[#allocation7 + $0x20] sm:$0xff] %v296_v37 }
 0x12c   :  { %v513_v38 = vpop.f32.mrb[0].mxu1 }
 0x12d   :  { %402 = vst.msk [vmem:[#allocation7 + $0x28] sm:$0xff] %vm398_vm14, %v513_v38  ;;  %v300_v39 = vpop.f32.mrb[4].mxu0  ;;  %v377_v40 = vpop.f32.mrb[1].mxu1 }
 0x12e   :  { %403 = vst [vmem:[#allocation7 + $0x30] sm:$0xff] %v300_v39  ;;  %399 = vst.msk [vmem:[#allocation7 + $0x10] sm:$0xff] %vm398_vm14, %v377_v40  ;;  %v302_v41 = vpop.f32.mrb[5].mxu0 }
 0x12f   :  { %404 = vst [vmem:[#allocation7 + $0x38] sm:$0xff] %v302_v41 }
 0x130   :  { %v516_v42 = vpop.f32.mrb[2].mxu1 }
 0x131   :  { %408 = vst.msk [vmem:[#allocation7 + $0x58] sm:$0xff] %vm398_vm14, %v516_v42  ;;  %v306_v43 = vpop.f32.mrb[6].mxu0  ;;  %v387_v44 = vpop.f32.mrb[3].mxu1 }
 0x132   :  { %406 = vst [vmem:[#allocation7 + $0x48] sm:$0xff] %v306_v43  ;;  %405 = vst.msk [vmem:[#allocation7 + $0x40] sm:$0xff] %vm398_vm14, %v387_v44  ;;  %v308_v45 = vpop.f32.mrb[7].mxu0 }
 0x133   :  { %407 = vst [vmem:[#allocation7 + $0x50] sm:$0xff] %v308_v45 }
 0x134   :  { %618 = shalt.err (!%p615_p6)
}
 0x135   :  { %s619_s10 = scalar_lea.hbm %s853_s2, 1536 }
 0x136   :  { %p620_p7 = scmp.ne.s32.totalorder %s853_s2, %s619_s10  ;;  %p623_p8 = scmp.lt.u32.totalorder %s619_s10, %s853_s2 }
 0x138   :  { %p625_p9 = pnand %p623_p8, %p620_p7 }
 0x13a   :  { %628 = shalt.err (!%p625_p9)
}
 0x13b   :  { %s643_s15 = smov 384   ;;  %s644_s16 = smov 24  }
 0x13c   :  { %420 = dma.vmem_to_hbm [thread:$0]  %s415_s6, 1536, %s853_s2, [#allocation4], %s643_s15, %s643_s15, %s644_s16  }
 0x13d   :  { %633 = dma.done.wait [#allocation4], 1536  }
 0x13e   :  { %634 = vsyncadd [#allocation4], 4294965760 }
 0x13f   :  { %424 = vsyncpa [#allocation3], 1 }
 0x140   :  { %425 = vsyncpa [#allocation6], 1 }
 0x141   :  { %426 = vsyncpa [#allocation4], 1 }

</bundles_post_ra>
